<compile_context>
chip_gen: v7x
topology: tpu7x:2x2x1
jax: 0.10.0
libtpu: 0.0.40
codegen_flags: <defaults>
</compile_context>

<pallas_src>
import jax
import jax.numpy as jnp
from jax.experimental import pallas as pl
from jax.experimental.pallas import tpu as pltpu


def _round_up(n, m):
    return (n + m - 1) // m * m


def _mlp_kernel(x_ref, w1_ref, b1_ref, w2_ref, b2_ref, w3_ref, b3_ref, o_ref):
    # x tile arrives as f32 straight from HBM; cast to bf16 only at the MXU boundary.
    x = x_ref[...].astype(jnp.bfloat16)
    # fc1 + ReLU : bf16 x bf16 on the MXU, f32 accumulate; bias/ReLU in f32.
    h1 = jnp.dot(x, w1_ref[...], preferred_element_type=jnp.float32)
    h1 = jnp.maximum(h1 + b1_ref[...], 0.0)
    # fc2 + ReLU
    h2 = jnp.dot(h1.astype(jnp.bfloat16), w2_ref[...],
                 preferred_element_type=jnp.float32)
    h2 = jnp.maximum(h2 + b2_ref[...], 0.0)
    # fc3 + tanh (output padded to 128 lanes -> unmasked vst; padded cols are 0)
    h3 = jnp.dot(h2.astype(jnp.bfloat16), w3_ref[...],
                 preferred_element_type=jnp.float32)
    o_ref[...] = jnp.tanh(h3 + b3_ref[...]).astype(o_ref.dtype)


def _mlp_call(x, params, out_dim, batch_tile, time_len=None):
    if time_len is None:
        B, K = x.shape
    else:
        B, _, K = x.shape

    w1, b1 = params["w1"], params["b1"]
    w2, b2 = params["w2"], params["b2"]
    w3, b3 = params["w3"], params["b3"]
    n_pad = w3.shape[1]  # lane-padded output width (128)

    # Batch tiling: near-full last tile, 16-aligned rows (bf16 sublane packing),
    # >=2 grid steps when the batch is big enough so v7x megacore shards it.
    n_tiles = pl.cdiv(B, batch_tile)
    if B >= 32:
        n_tiles = max(n_tiles, 2)
    tb = _round_up(pl.cdiv(B, n_tiles), 16)
    grid = (pl.cdiv(B, tb),)

    if time_len is None:
        x_spec = pl.BlockSpec((tb, K), lambda i: (i, 0))
    else:
        # Fused last-timestep select: squeezed size-1 time dim, index_map picks T-1.
        x_spec = pl.BlockSpec((tb, None, K), lambda i: (i, time_len - 1, 0))

    # Constant index_map -> same block every grid step (weights stay VMEM-resident).
    # NOTE: single-buffering these via pipeline_mode=pl.Buffered(1) would save
    # ~0.7 MB VMEM but isn't needed at these tile sizes, so we keep the default.
    resident = lambda a: pl.BlockSpec(a.shape, lambda i: (0, 0))

    out = pl.pallas_call(
        _mlp_kernel,
        out_shape=jax.ShapeDtypeStruct((B, n_pad), jnp.float32),
        grid=grid,
        in_specs=[
            x_spec,
            resident(w1), resident(b1),
            resident(w2), resident(b2),
            resident(w3), resident(b3),
        ],
        out_specs=pl.BlockSpec((tb, n_pad), lambda i: (i, 0)),
        compiler_params=pltpu.CompilerParams(dimension_semantics=("parallel",)),
    )(x, w1, b1, w2, b2, w3, b3)

    return out[:, :out_dim]


def simple_mlp_forward(x, params, out_dim, *, batch_tile=512):
    """Forward pass of SimpleMLP.

    x: (B, input_dim) or (B, T, input_dim) float32 — if 3-D, the last timestep is
       used (selection fused into the kernel's BlockSpec when supported).
    params: dict with bf16 weights pre-transposed to (in, out), f32 (1, out) biases;
            fc3 is zero-padded to 128 output columns.
    """
    if x.ndim == 3:
        try:
            return _mlp_call(x, params, out_dim, batch_tile, time_len=x.shape[1])
        except Exception:
            # TODO(synk): squeezed-time BlockSpec rejected by this jax/Mosaic version;
            # fall back to a wrapper-side last-timestep slice (one extra (B, K) copy).
            x = x[:, -1, :]
    return _mlp_call(x, params, out_dim, batch_tile)


def init_params(key, input_dim, output_dim):
    """Init mirroring PyTorch nn.Linear default (U[-1/sqrt(fan_in), +1/sqrt(fan_in)]).

    Weights stored transposed (in, out) in bf16; fc3 zero-padded to 128 out columns;
    biases stored as (1, out) f32.
    """
    h1, h2 = 256, 128
    n_pad = max(_round_up(output_dim, 128), 128)
    ks = jax.random.split(key, 6)

    def linear(kw, kb, fan_in, fan_out, pad_out=None):
        bound = 1.0 / (fan_in ** 0.5)
        w = jax.random.uniform(kw, (fan_in, fan_out), jnp.float32, -bound, bound)
        b = jax.random.uniform(kb, (fan_out,), jnp.float32, -bound, bound)
        if pad_out is not None and pad_out != fan_out:
            w = jnp.pad(w, ((0, 0), (0, pad_out - fan_out)))  # zero cols, sliced later
            b = jnp.pad(b, (0, pad_out - fan_out))
        return w.astype(jnp.bfloat16), b.reshape(1, -1)

    w1, b1 = linear(ks[0], ks[1], input_dim, h1)
    w2, b2 = linear(ks[2], ks[3], h1, h2)
    w3, b3 = linear(ks[4], ks[5], h2, output_dim, pad_out=n_pad)
    return {"w1": w1, "b1": b1, "w2": w2, "b2": b2, "w3": w3, "b3": b3}


def reference_forward(x, params, out_dim):
    """Pure-JAX reference with the same bf16-weight / f32-accumulate recipe."""
    if x.ndim == 3:
        x = x[:, -1, :]
    h = jnp.dot(x.astype(jnp.bfloat16), params["w1"],
                preferred_element_type=jnp.float32) + params["b1"]
    h = jnp.maximum(h, 0.0)
    h = jnp.dot(h.astype(jnp.bfloat16), params["w2"],
                preferred_element_type=jnp.float32) + params["b2"]
    h = jnp.maximum(h, 0.0)
    h = jnp.dot(h.astype(jnp.bfloat16), params["w3"],
                preferred_element_type=jnp.float32) + params["b3"]
    return jnp.tanh(h)[:, :out_dim]


if __name__ == "__main__":
    input_dim = 1081   # e.g. LiDAR scan points, as in the module docstring
    output_dim = 2
    batch = 8

    key = jax.random.PRNGKey(0)
    kx2, kx3, kp = jax.random.split(key, 3)
    params = init_params(kp, input_dim, output_dim)

    # 2-D input (the module's documented/primary case).
    x2 = jax.random.normal(kx2, (batch, input_dim), jnp.float32)
    out2 = jax.block_until_ready(simple_mlp_forward(x2, params, output_dim))
    ref2 = jax.block_until_ready(reference_forward(x2, params, output_dim))
    assert out2.shape == (batch, output_dim)
    assert jnp.allclose(out2, ref2, atol=5e-3, rtol=5e-3), float(
        jnp.max(jnp.abs(out2 - ref2)))

    # 3-D input (last-timestep selection fused into the kernel when supported).
    x3 = jax.random.normal(kx3, (batch, 4, input_dim), jnp.float32)
    out3 = jax.block_until_ready(simple_mlp_forward(x3, params, output_dim))
    ref3 = jax.block_until_ready(reference_forward(x3, params, output_dim))
    assert out3.shape == (batch, output_dim)
    assert jnp.allclose(out3, ref3, atol=5e-3, rtol=5e-3), float(
        jnp.max(jnp.abs(out3 - ref3)))

    print("KERNEL_OK")
</pallas_src>

<mosaic_0001>
module attributes {stable_mosaic.version = 11 : i64} {
  func.func @_mlp_kernel(%arg0: i32, %arg1: memref<16x1081xf32, #tpu.memory_space<vmem>>, %arg2: memref<1081x256xbf16, #tpu.memory_space<vmem>>, %arg3: memref<1x256xf32, #tpu.memory_space<vmem>>, %arg4: memref<256x128xbf16, #tpu.memory_space<vmem>>, %arg5: memref<1x128xf32, #tpu.memory_space<vmem>>, %arg6: memref<128x128xbf16, #tpu.memory_space<vmem>>, %arg7: memref<1x128xf32, #tpu.memory_space<vmem>>, %arg8: memref<16x128xf32, #tpu.memory_space<vmem>>) attributes {dimension_semantics = [#tpu.dimension_semantics<parallel>], iteration_bounds = array<i64: 1>, scalar_prefetch = 0 : i64, scratch_operands = 0 : i64, tpu.core_type = #tpu.core_type<tc>, window_params = [{transform_indices = @transform_0, window_bounds = array<i64: 16, 1081>}, {pipeline_mode = #tpu.pipeline_mode<synchronous>, transform_indices = @transform_1, window_bounds = array<i64: 1081, 256>}, {pipeline_mode = #tpu.pipeline_mode<synchronous>, transform_indices = @transform_2, window_bounds = array<i64: 1, 256>}, {pipeline_mode = #tpu.pipeline_mode<synchronous>, transform_indices = @transform_3, window_bounds = array<i64: 256, 128>}, {pipeline_mode = #tpu.pipeline_mode<synchronous>, transform_indices = @transform_4, window_bounds = array<i64: 1, 128>}, {pipeline_mode = #tpu.pipeline_mode<synchronous>, transform_indices = @transform_5, window_bounds = array<i64: 128, 128>}, {pipeline_mode = #tpu.pipeline_mode<synchronous>, transform_indices = @transform_6, window_bounds = array<i64: 1, 128>}, {transform_indices = @transform_7, window_bounds = array<i64: 16, 128>}]} {
    %c0 = arith.constant 0 : index
    %c0_0 = arith.constant 0 : index
    %0 = vector.load %arg1[%c0, %c0_0] : memref<16x1081xf32, #tpu.memory_space<vmem>>, vector<16x1081xf32>
    %1 = arith.truncf %0 : vector<16x1081xf32> to vector<16x1081xbf16>
    %c0_1 = arith.constant 0 : index
    %c0_2 = arith.constant 0 : index
    %2 = vector.load %arg2[%c0_1, %c0_2] : memref<1081x256xbf16, #tpu.memory_space<vmem>>, vector<1081x256xbf16>
    %cst = arith.constant dense<0.000000e+00> : vector<16x256xf32>
    %3 = tpu.matmul %1, %2, %cst {dimension_numbers = #tpu.dot_dimension_numbers<[1], [0], [0], [1], [0, 0, 1, 1], [], []>} : vector<16x1081xbf16>, vector<1081x256xbf16>, vector<16x256xf32> -> vector<16x256xf32>
    %c0_3 = arith.constant 0 : index
    %c0_4 = arith.constant 0 : index
    %4 = vector.load %arg3[%c0_3, %c0_4] : memref<1x256xf32, #tpu.memory_space<vmem>>, vector<1x256xf32>
    %5 = vector.broadcast %4 : vector<1x256xf32> to vector<16x256xf32>
    %6 = arith.addf %3, %5 : vector<16x256xf32>
    %cst_5 = arith.constant 0.000000e+00 : f32
    %7 = vector.broadcast %cst_5 : f32 to vector<16x256xf32>
    %8 = arith.maximumf %6, %7 : vector<16x256xf32>
    %9 = arith.truncf %8 : vector<16x256xf32> to vector<16x256xbf16>
    %c0_6 = arith.constant 0 : index
    %c0_7 = arith.constant 0 : index
    %10 = vector.load %arg4[%c0_6, %c0_7] : memref<256x128xbf16, #tpu.memory_space<vmem>>, vector<256x128xbf16>
    %cst_8 = arith.constant dense<0.000000e+00> : vector<16x128xf32>
    %11 = tpu.matmul %9, %10, %cst_8 {dimension_numbers = #tpu.dot_dimension_numbers<[1], [0], [0], [1], [0, 0, 1, 1], [], []>} : vector<16x256xbf16>, vector<256x128xbf16>, vector<16x128xf32> -> vector<16x128xf32>
    %c0_9 = arith.constant 0 : index
    %c0_10 = arith.constant 0 : index
    %12 = vector.load %arg5[%c0_9, %c0_10] : memref<1x128xf32, #tpu.memory_space<vmem>>, vector<1x128xf32>
    %13 = vector.broadcast %12 : vector<1x128xf32> to vector<16x128xf32>
    %14 = arith.addf %11, %13 : vector<16x128xf32>
    %cst_11 = arith.constant 0.000000e+00 : f32
    %15 = vector.broadcast %cst_11 : f32 to vector<16x128xf32>
    %16 = arith.maximumf %14, %15 : vector<16x128xf32>
    %17 = arith.truncf %16 : vector<16x128xf32> to vector<16x128xbf16>
    %c0_12 = arith.constant 0 : index
    %c0_13 = arith.constant 0 : index
    %18 = vector.load %arg6[%c0_12, %c0_13] : memref<128x128xbf16, #tpu.memory_space<vmem>>, vector<128x128xbf16>
    %cst_14 = arith.constant dense<0.000000e+00> : vector<16x128xf32>
    %19 = tpu.matmul %17, %18, %cst_14 {dimension_numbers = #tpu.dot_dimension_numbers<[1], [0], [0], [1], [0, 0, 1, 1], [], []>} : vector<16x128xbf16>, vector<128x128xbf16>, vector<16x128xf32> -> vector<16x128xf32>
    %c0_15 = arith.constant 0 : index
    %c0_16 = arith.constant 0 : index
    %20 = vector.load %arg7[%c0_15, %c0_16] : memref<1x128xf32, #tpu.memory_space<vmem>>, vector<1x128xf32>
    %21 = vector.broadcast %20 : vector<1x128xf32> to vector<16x128xf32>
    %22 = arith.addf %19, %21 : vector<16x128xf32>
    %23 = math.tanh %22 : vector<16x128xf32>
    %c0_17 = arith.constant 0 : index
    %c0_18 = arith.constant 0 : index
    %24 = vector.load %arg8[%c0_17, %c0_18] : memref<16x128xf32, #tpu.memory_space<vmem>>, vector<16x128xf32>
    tpu.vector_store %arg8[%c0_17, %c0_18], %23 {strides = array<i32>} : memref<16x128xf32, #tpu.memory_space<vmem>>, vector<16x128xf32>,
    return
  }
  func.func @transform_0(%arg0: i32) -> (i32, i32) {
    %c0_i32 = arith.constant 0 : i32
    %c0_i32_0 = arith.constant 0 : i32
    return %arg0, %c0_i32 : i32, i32
  }
  func.func @transform_1(%arg0: i32) -> (i32, i32) {
    %c0_i32 = arith.constant 0 : i32
    %c0_i32_0 = arith.constant 0 : i32
    %c0_i32_1 = arith.constant 0 : i32
    return %c0_i32, %c0_i32_0 : i32, i32
  }
  func.func @transform_2(%arg0: i32) -> (i32, i32) {
    %c0_i32 = arith.constant 0 : i32
    %c0_i32_0 = arith.constant 0 : i32
    %c0_i32_1 = arith.constant 0 : i32
    return %c0_i32, %c0_i32_0 : i32, i32
  }
  func.func @transform_3(%arg0: i32) -> (i32, i32) {
    %c0_i32 = arith.constant 0 : i32
    %c0_i32_0 = arith.constant 0 : i32
    %c0_i32_1 = arith.constant 0 : i32
    return %c0_i32, %c0_i32_0 : i32, i32
  }
  func.func @transform_4(%arg0: i32) -> (i32, i32) {
    %c0_i32 = arith.constant 0 : i32
    %c0_i32_0 = arith.constant 0 : i32
    %c0_i32_1 = arith.constant 0 : i32
    return %c0_i32, %c0_i32_0 : i32, i32
  }
  func.func @transform_5(%arg0: i32) -> (i32, i32) {
    %c0_i32 = arith.constant 0 : i32
    %c0_i32_0 = arith.constant 0 : i32
    %c0_i32_1 = arith.constant 0 : i32
    return %c0_i32, %c0_i32_0 : i32, i32
  }
  func.func @transform_6(%arg0: i32) -> (i32, i32) {
    %c0_i32 = arith.constant 0 : i32
    %c0_i32_0 = arith.constant 0 : i32
    %c0_i32_1 = arith.constant 0 : i32
    return %c0_i32, %c0_i32_0 : i32, i32
  }
  func.func @transform_7(%arg0: i32) -> (i32, i32) {
    %c0_i32 = arith.constant 0 : i32
    %c0_i32_0 = arith.constant 0 : i32
    return %arg0, %c0_i32 : i32, i32
  }
}

</mosaic_0001>

<bundles_post_ra>
// kernel: tpu_custom_call.1
= control target key start
LH: loop header
LB: loop body
LE: loop exit
PB: predicated region body
PF: predicated region fallthrough
CT: control target
= control target key end

     0   :  { %12 = vsyncpa [#allocation3], 0  ;;  %s2214_s0 = inlined_call_operand.hbm [shape: f32[8,1081], index: 0, kind: input, shape index: {}]   ;;  %s2215_s1 = inlined_call_operand.hbm [shape: bf16[1081,256], index: 1, kind: input, shape index: {}]   ;;  %s2216_s2 = inlined_call_operand.vmem [shape: f32[1,256], index: 2, kind: input, shape index: {}]   ;;  %s2217_s3 = inlined_call_operand.hbm [shape: bf16[256,128], index: 3, kind: input, shape index: {}]   ;;  %s2218_s4 = inlined_call_operand.vmem [shape: f32[1,128], index: 4, kind: input, shape index: {}]   ;;  %s2219_s5 = inlined_call_operand.hbm [shape: bf16[128,128], index: 5, kind: input, shape index: {}]   ;;  %s2220_s6 = inlined_call_operand.vmem [shape: f32[1,128], index: 6, kind: input, shape index: {}]   ;;  %s2221_s7 = inlined_call_operand.hbm [shape: f32[8,128], index: 7, kind: output, shape index: {}]  }
   0x1   :  { %13 = vsyncpa [#allocation6], 0 }
   0x2   :  { %14 = vsyncpa [#allocation9], 0 }
   0x3   :  { %15 = vsyncpa [#allocation4], 0 }
   0x4   :  { %20 = vsyncadd [#allocation3], 1152  ;;  %s2084_s24 = smov [#allocation5]   ;;  %s1966_s28 = scalar_lea.hbm %s2215_s1, 17408 }
   0x5   :  { %s33_s25 = sshll.u32 %s2084_s24, 4  ;;  %p1967_p0 = scmp.ne.s32.totalorder %s2215_s1, %s1966_s28  ;;  %s34_s25 = int_to_ptr.vmem [resolvable:$true] %s33_s25 }
   0x6   :  { %p1970_p1 = scmp.lt.u32.totalorder %s1966_s28, %s2215_s1 }
   0x8   :  { %p1972_p2 = pnand %p1970_p1, %p1967_p0 }
   0xa   :  { %1975 = shalt.err (!%p1972_p2)
}
   0xb   :  { %s1976_s10 = scalar_lea.vmem %s34_s25, 17408  ;;  %p1981_p4 = scmp.lt.s32.totalorder %s34_s25, %s34_s25 }
   0xc   :  { %p1977_p3 = scmp.ne.s32.totalorder %s34_s25, %s1976_s10  ;;  %p1982_p5 = scmp.lt.s32.totalorder %s1976_s10, %s1976_s10 }
   0xe   :  { %p1983_p6 = por %p1982_p5, %p1981_p4 }
  0x10   :  { %p1984_p7 = pnand %p1983_p6, %p1977_p3 }
  0x12   :  { %1987 = shalt.err (!%p1984_p7)
}
  0x13   :  { %s2085_s11 = smov 128   ;;  %s2086_s12 = smov 8  }
  0x14   :  { %39 = dma.hbm_to_vmem [thread:$0]  %s2215_s1, 17408, %s34_s25, [#allocation6], %s2085_s11, %s2085_s11, %s2086_s12  }
  0x15   :  { %s2087_s15 = smov [#allocation2]   ;;  %s1988_s19 = scalar_lea.hbm %s2214_s0, 1152 }
  0x16   :  { %s21_s16 = sshll.u32 %s2087_s15, 4  ;;  %p1989_p8 = scmp.ne.s32.totalorder %s2214_s0, %s1988_s19  ;;  %s22_s16 = int_to_ptr.vmem [resolvable:$true] %s21_s16 }
  0x17   :  { %p1992_p9 = scmp.lt.u32.totalorder %s1988_s19, %s2214_s0 }
  0x19   :  { %p1994_p10 = pnand %p1992_p9, %p1989_p8 }
  0x1b   :  { %1997 = shalt.err (!%p1994_p10)
}
  0x1c   :  { %s1998_s24 = scalar_lea.vmem %s22_s16, 1152  ;;  %s2002_s1 = scalar_lea.vmem %s22_s16, 2304 }
  0x1d   :  { %p1999_p11 = scmp.ne.s32.totalorder %s22_s16, %s1998_s24  ;;  %p2003_p12 = scmp.lt.s32.totalorder %s22_s16, %s22_s16 }
  0x1e   :  { %p2004_p13 = scmp.lt.s32.totalorder %s2002_s1, %s1998_s24 }
  0x20   :  { %p2005_p0 = por %p2004_p13, %p2003_p12 }
  0x22   :  { %p2006_p1 = pnand %p2005_p0, %p1999_p11 }
  0x24   :  { %2009 = shalt.err (!%p2006_p1)
}
  0x25   :  { %s2088_s25 = smov 1152   ;;  %s2089_s26 = smov 72  }
  0x26   :  { %27 = dma.hbm_to_vmem [thread:$0]  %s2214_s0, 1152, %s22_s16, [#allocation3], %s2088_s25, %s2088_s25, %s2089_s26  }
  0x27   :  { %s2090_s29 = smov [#allocation7]   ;;  %s2010_s10 = scalar_lea.hbm %s2217_s3, 2048 }
  0x28   :  { %s47_s30 = sshll.u32 %s2090_s29, 4  ;;  %p2011_p2 = scmp.ne.s32.totalorder %s2217_s3, %s2010_s10  ;;  %s48_s30 = int_to_ptr.vmem [resolvable:$true] %s47_s30 }
  0x29   :  { %p2014_p3 = scmp.lt.u32.totalorder %s2010_s10, %s2217_s3 }
  0x2b   :  { %p2016_p4 = pnand %p2014_p3, %p2011_p2 }
  0x2d   :  { %2019 = shalt.err (!%p2016_p4)
}
  0x2e   :  { %s2020_s18 = scalar_lea.vmem %s48_s30, 2048  ;;  %p2025_p6 = scmp.lt.s32.totalorder %s48_s30, %s48_s30 }
  0x2f   :  { %p2021_p5 = scmp.ne.s32.totalorder %s48_s30, %s2020_s18  ;;  %p2026_p7 = scmp.lt.s32.totalorder %s2020_s18, %s2020_s18 }
  0x31   :  { %p2027_p8 = por %p2026_p7, %p2025_p6 }
  0x33   :  { %p2028_p9 = pnand %p2027_p8, %p2021_p5 }
  0x35   :  { %2031 = shalt.err (!%p2028_p9)
}
  0x36   :  { %s2091_s0 = smov 64   ;;  %s2092_s16 = smov 4  }
  0x37   :  { %53 = dma.hbm_to_vmem [thread:$0]  %s2217_s3, 2048, %s48_s30, [#allocation6], %s2091_s0, %s2091_s0, %s2092_s16  }
  0x38   :  { %s2093_s21 = smov [#allocation8]   ;;  %s2032_s1 = scalar_lea.hbm %s2219_s5, 1024 }
  0x39   :  { %s61_s22 = sshll.u32 %s2093_s21, 4  ;;  %p2033_p10 = scmp.ne.s32.totalorder %s2219_s5, %s2032_s1  ;;  %s62_s22 = int_to_ptr.vmem [resolvable:$true] %s61_s22 }
  0x3a   :  { %p2036_p11 = scmp.lt.u32.totalorder %s2032_s1, %s2219_s5 }
  0x3c   :  { %p2038_p12 = pnand %p2036_p11, %p2033_p10 }
  0x3e   :  { %2041 = shalt.err (!%p2038_p12)
}
  0x3f   :  { %s2042_s29 = scalar_lea.vmem %s62_s22, 1024  ;;  %p2047_p0 = scmp.lt.s32.totalorder %s62_s22, %s62_s22 }
  0x40   :  { %p2043_p13 = scmp.ne.s32.totalorder %s62_s22, %s2042_s29  ;;  %p2048_p1 = scmp.lt.s32.totalorder %s2042_s29, %s2042_s29 }
  0x42   :  { %p2049_p2 = por %p2048_p1, %p2047_p0 }
  0x44   :  { %p2050_p3 = pnand %p2049_p2, %p2043_p13 }
  0x46   :  { %2053 = shalt.err (!%p2050_p3)
}
  0x47   :  { %67 = dma.hbm_to_vmem [thread:$0]  %s2219_s5, 1024, %s62_s22, [#allocation9], %s2091_s0, %s2091_s0, %s2092_s16  }
  0x48   :  { %2076 = dma.done.wait [#allocation3], 2304  }
  0x49   :  { %2077 = vsyncadd [#allocation3], 4294964992 }
  0x4a   :  { %2078 = dma.done.wait [#allocation6], 19456  }
  0x4b   :  { %2079 = vsyncadd [#allocation6], 4294947840 }
  0x4c   :  { %2080 = dma.done.wait [#allocation9], 1024  }
  0x4d   :  { %2081 = vsyncadd [#allocation9], 4294966272  ;;  %v1734_v0 = vld [vmem:[#allocation5 + $0x4] ss:$8 sps:$4 sm:$0xff]   ;;  %v1738_v2 = vld [vmem:[#allocation5] ss:$8 sps:$4 sm:$0xff]  }
  0x4e   :  { %v1736_v1 = vld [vmem:[#allocation5 + $0x204] ss:$8 sps:$4 sm:$0xff]   ;;  %950 = vmatprep.subr.bf16.mxu1 %v1734_v0  ;;  %v1739_v3 = vld [vmem:[#allocation5 + $0x200] ss:$8 sps:$4 sm:$0xff]   ;;  %v1740_v4 = vld [vmem:[#allocation5 + $0x14] ss:$8 sps:$4 sm:$0xff]  }
  0x4f   :  { %1036 = vmatprep.subr.bf16.mxu0 %v1736_v1  ;;  %951 = vmatpush1.bf16.msra.mxu1 %v1738_v2  ;;  %v1742_v5 = vld [vmem:[#allocation5 + $0x214] ss:$8 sps:$4 sm:$0xff]   ;;  %v1744_v6 = vld [vmem:[#allocation5 + $0x10] ss:$8 sps:$4 sm:$0xff]   ;;  %v1746_v8 = vld [vmem:[#allocation5 + $0x24] ss:$8 sps:$4 sm:$0xff]  }
  0x50   :  { %1037 = vmatpush1.bf16.msra.mxu0 %v1739_v3  ;;  %952 = vmatprep.subr.bf16.mxu1 %v1740_v4  ;;  %v1745_v7 = vld [vmem:[#allocation5 + $0x210] ss:$8 sps:$4 sm:$0xff]   ;;  %v1748_v9 = vld [vmem:[#allocation5 + $0x224] ss:$8 sps:$4 sm:$0xff]   ;;  %v1750_v10 = vld [vmem:[#allocation5 + $0x20] ss:$8 sps:$4 sm:$0xff]  }
  0x51   :  { %1038 = vmatprep.subr.bf16.mxu0 %v1742_v5  ;;  %v1751_v11 = vld [vmem:[#allocation5 + $0x220] ss:$8 sps:$4 sm:$0xff]   ;;  %v1752_v12 = vld [vmem:[#allocation5 + $0x34] ss:$8 sps:$4 sm:$0xff]   ;;  %v1756_v14 = vld [vmem:[#allocation5 + $0x30] ss:$8 sps:$4 sm:$0xff]  }
  0x52   :  { %v1754_v13 = vld [vmem:[#allocation5 + $0x234] ss:$8 sps:$4 sm:$0xff]   ;;  %v1757_v15 = vld [vmem:[#allocation5 + $0x230] ss:$8 sps:$4 sm:$0xff]   ;;  %v1758_v16 = vld [vmem:[#allocation5 + $0x44] ss:$8 sps:$4 sm:$0xff]  }
  0x53   :  { %953 = vmatpush1.bf16.msra.mxu1 %v1744_v6  ;;  %v1760_v17 = vld [vmem:[#allocation5 + $0x244] ss:$8 sps:$4 sm:$0xff]   ;;  %v1762_v18 = vld [vmem:[#allocation5 + $0x40] ss:$8 sps:$4 sm:$0xff]   ;;  %v1764_v20 = vld [vmem:[#allocation5 + $0x54] ss:$8 sps:$4 sm:$0xff]  }
  0x54   :  { %1039 = vmatpush1.bf16.msra.mxu0 %v1745_v7  ;;  %954 = vmatprep.subr.bf16.mxu1 %v1746_v8  ;;  %v1763_v19 = vld [vmem:[#allocation5 + $0x240] ss:$8 sps:$4 sm:$0xff]   ;;  %v1766_v21 = vld [vmem:[#allocation5 + $0x254] ss:$8 sps:$4 sm:$0xff]   ;;  %v1768_v22 = vld [vmem:[#allocation5 + $0x50] ss:$8 sps:$4 sm:$0xff]  }
  0x55   :  { %1040 = vmatprep.subr.bf16.mxu0 %v1748_v9  ;;  %v1769_v23 = vld [vmem:[#allocation5 + $0x250] ss:$8 sps:$4 sm:$0xff]   ;;  %v1770_v24 = vld [vmem:[#allocation5 + $0x64] ss:$8 sps:$4 sm:$0xff]   ;;  %v1774_v26 = vld [vmem:[#allocation5 + $0x60] ss:$8 sps:$4 sm:$0xff]  }
  0x56   :  { %v1772_v25 = vld [vmem:[#allocation5 + $0x264] ss:$8 sps:$4 sm:$0xff]   ;;  %v1775_v27 = vld [vmem:[#allocation5 + $0x260] ss:$8 sps:$4 sm:$0xff]   ;;  %v1776_v28 = vld [vmem:[#allocation5 + $0x74] ss:$8 sps:$4 sm:$0xff]  }
  0x57   :  { %955 = vmatpush1.bf16.msra.mxu1 %v1750_v10  ;;  %v1778_v29 = vld [vmem:[#allocation5 + $0x274] ss:$8 sps:$4 sm:$0xff]   ;;  %v1780_v30 = vld [vmem:[#allocation5 + $0x70] ss:$8 sps:$4 sm:$0xff]   ;;  %v1782_v32 = vld [vmem:[#allocation5 + $0x84] ss:$8 sps:$4 sm:$0xff]  }
  0x58   :  { %1041 = vmatpush1.bf16.msra.mxu0 %v1751_v11  ;;  %956 = vmatprep.subr.bf16.mxu1 %v1752_v12  ;;  %v1781_v31 = vld [vmem:[#allocation5 + $0x270] ss:$8 sps:$4 sm:$0xff]   ;;  %v1784_v33 = vld [vmem:[#allocation5 + $0x284] ss:$8 sps:$4 sm:$0xff]   ;;  %v1786_v34 = vld [vmem:[#allocation5 + $0x80] ss:$8 sps:$4 sm:$0xff]  }
  0x59   :  { %1042 = vmatprep.subr.bf16.mxu0 %v1754_v13  ;;  %v1787_v35 = vld [vmem:[#allocation5 + $0x280] ss:$8 sps:$4 sm:$0xff]   ;;  %v1788_v36 = vld [vmem:[#allocation5 + $0x94] ss:$8 sps:$4 sm:$0xff]   ;;  %v1792_v38 = vld [vmem:[#allocation5 + $0x90] ss:$8 sps:$4 sm:$0xff]  }
  0x5a   :  { %v1790_v37 = vld [vmem:[#allocation5 + $0x294] ss:$8 sps:$4 sm:$0xff]   ;;  %v1793_v39 = vld [vmem:[#allocation5 + $0x290] ss:$8 sps:$4 sm:$0xff]   ;;  %v1794_v40 = vld [vmem:[#allocation5 + $0xa4] ss:$8 sps:$4 sm:$0xff]  }
  0x5b   :  { %957 = vmatpush1.bf16.msra.mxu1 %v1756_v14  ;;  %v1796_v41 = vld [vmem:[#allocation5 + $0x2a4] ss:$8 sps:$4 sm:$0xff]   ;;  %v1798_v42 = vld [vmem:[#allocation5 + $0xa0] ss:$8 sps:$4 sm:$0xff]   ;;  %v1800_v44 = vld [vmem:[#allocation5 + $0xb4] ss:$8 sps:$4 sm:$0xff]  }
  0x5c   :  { %1043 = vmatpush1.bf16.msra.mxu0 %v1757_v15  ;;  %958 = vmatprep.subr.bf16.mxu1 %v1758_v16  ;;  %v1799_v43 = vld [vmem:[#allocation5 + $0x2a0] ss:$8 sps:$4 sm:$0xff]   ;;  %v1802_v45 = vld [vmem:[#allocation5 + $0x2b4] ss:$8 sps:$4 sm:$0xff]   ;;  %v1804_v46 = vld [vmem:[#allocation5 + $0xb0] ss:$8 sps:$4 sm:$0xff]  }
  0x5d   :  { %1044 = vmatprep.subr.bf16.mxu0 %v1760_v17  ;;  %v1805_v47 = vld [vmem:[#allocation5 + $0x2b0] ss:$8 sps:$4 sm:$0xff]   ;;  %v93_v49 = vld [vmem:[#allocation2 + $0x50] sm:$0xff]  ;;  %v1812_v58 = vld [vmem:[#allocation5 + $0xd4] ss:$8 sps:$4 sm:$0xff]   ;;  %vm940_vm0 = vcmask 1043456  }
  0x5e   :  { %v84_v48 = vld [vmem:[#allocation2 + $0x8] sm:$0xff]  ;;  %v1806_v50 = vld [vmem:[#allocation5 + $0xc4] ss:$8 sps:$4 sm:$0xff]   ;;  %v1810_v56 = vld [vmem:[#allocation5 + $0xc0] ss:$8 sps:$4 sm:$0xff]   ;;  %vm941_vm1 = vcmask 1044480  }
  0x5f   :  { %959 = vmatpush1.bf16.msra.mxu1 %v1762_v18  ;;  %v1808_v51 = vld [vmem:[#allocation5 + $0x2c4] ss:$8 sps:$4 sm:$0xff]   ;;  %v102_v52 = vpack.c.bf16 %v93_v49, %v84_v48  ;;  %v88_v53 = vld [vmem:[#allocation2 + $0x28] sm:$0xff]  ;;  %v1811_v57 = vld [vmem:[#allocation5 + $0x2c0] ss:$8 sps:$4 sm:$0xff]   ;;  %vm936_vm2 = vcmask 465920  }
  0x60   :  { %1045 = vmatpush1.bf16.msra.mxu0 %v1763_v19  ;;  %960 = vmatprep.subr.bf16.mxu1 %v1764_v20  ;;  %v97_v54 = vld [vmem:[#allocation2 + $0x70] sm:$0xff]  ;;  %v1814_v59 = vld [vmem:[#allocation5 + $0x2d4] ss:$8 sps:$4 sm:$0xff]   ;;  %v1816_v60 = vld [vmem:[#allocation5 + $0xd0] ss:$8 sps:$4 sm:$0xff]   ;;  %vm2097_vm3 = vmmov 0  }
  0x61   :  { %1046 = vmatprep.subr.bf16.mxu0 %v1766_v21  ;;  %982 = vmatprep.mubr.bf16.mxu1 %v102_v52  ;;  %v106_v55 = vpack.c.bf16 %v97_v54, %v88_v53  ;;  %v1817_v61 = vld [vmem:[#allocation5 + $0x2d0] ss:$8 sps:$4 sm:$0xff]   ;;  %v1818_v62 = vld [vmem:[#allocation5 + $0xe4] ss:$8 sps:$4 sm:$0xff]   ;;  %v1822_v0 = vld [vmem:[#allocation5 + $0xe0] ss:$8 sps:$4 sm:$0xff]  }
  0x62   :  { %v1820_v63 = vld [vmem:[#allocation5 + $0x2e4] ss:$8 sps:$4 sm:$0xff]   ;;  %v1823_v1 = vld [vmem:[#allocation5 + $0x2e0] ss:$8 sps:$4 sm:$0xff]   ;;  %v1824_v2 = vld [vmem:[#allocation5 + $0xf4] ss:$8 sps:$4 sm:$0xff]  }
  0x63   :  { %961 = vmatpush1.bf16.msra.mxu1 %v1768_v22  ;;  %1068 = vmatprep.mubr.bf16.mxu0 %v106_v55  ;;  %v1826_v3 = vld [vmem:[#allocation5 + $0x2f4] ss:$8 sps:$4 sm:$0xff]   ;;  %v1828_v4 = vld [vmem:[#allocation5 + $0xf0] ss:$8 sps:$4 sm:$0xff]   ;;  %v1832_v7 = vld [vmem:[#allocation5 + $0x104] ss:$8 sps:$4 sm:$0xff]  }
  0x64   :  { %1047 = vmatpush1.bf16.msra.mxu0 %v1769_v23  ;;  %962 = vmatprep.subr.bf16.mxu1 %v1770_v24  ;;  %v1829_v5 = vld [vmem:[#allocation5 + $0x2f0] ss:$8 sps:$4 sm:$0xff]   ;;  %v1835_v11 = vld [vmem:[#allocation5 + $0x304] ss:$8 sps:$4 sm:$0xff]   ;;  %v1830_v12 = vld [vmem:[#allocation5 + $0x100] ss:$8 sps:$4 sm:$0xff]  }
  0x65   :  { %1048 = vmatprep.subr.bf16.mxu0 %v1772_v25  ;;  %v83_v6 = vld [vmem:[#allocation2] sm:$0xff]  ;;  %v92_v8 = vld [vmem:[#allocation2 + $0x48] sm:$0xff]  ;;  %v1833_v13 = vld [vmem:[#allocation5 + $0x300] ss:$8 sps:$4 sm:$0xff]  }
  0x66   :  { %v87_v9 = vld [vmem:[#allocation2 + $0x20] sm:$0xff]  ;;  %v96_v10 = vld [vmem:[#allocation2 + $0x68] sm:$0xff]  ;;  %v101_v14 = vpack.c.bf16 %v92_v8, %v83_v6  ;;  %v1844_v20 = vld [vmem:[#allocation5 + $0x124] ss:$8 sps:$4 sm:$0xff]  }
  0x67   :  { %963 = vmatpush1.bf16.msra.mxu1 %v1774_v26  ;;  %v105_v15 = vpack.c.bf16 %v96_v10, %v87_v9  ;;  %v1838_v16 = vld [vmem:[#allocation5 + $0x114] ss:$8 sps:$4 sm:$0xff]   ;;  %v1836_v18 = vld [vmem:[#allocation5 + $0x110] ss:$8 sps:$4 sm:$0xff]   ;;  %v1847_v21 = vld [vmem:[#allocation5 + $0x324] ss:$8 sps:$4 sm:$0xff]  }
  0x68   :  { %1049 = vmatpush1.bf16.msra.mxu0 %v1775_v27  ;;  %964 = vmatprep.subr.bf16.mxu1 %v1776_v28  ;;  %v1841_v17 = vld [vmem:[#allocation5 + $0x314] ss:$8 sps:$4 sm:$0xff]   ;;  %v1839_v19 = vld [vmem:[#allocation5 + $0x310] ss:$8 sps:$4 sm:$0xff]   ;;  %v1842_v22 = vld [vmem:[#allocation5 + $0x120] ss:$8 sps:$4 sm:$0xff]  }
  0x69   :  { %1050 = vmatprep.subr.bf16.mxu0 %v1778_v29  ;;  %v1845_v23 = vld [vmem:[#allocation5 + $0x320] ss:$8 sps:$4 sm:$0xff]   ;;  %v1850_v24 = vld [vmem:[#allocation5 + $0x134] ss:$8 sps:$4 sm:$0xff]   ;;  %v1848_v26 = vld [vmem:[#allocation5 + $0x130] ss:$8 sps:$4 sm:$0xff]  }
  0x6a   :  { %v1853_v25 = vld [vmem:[#allocation5 + $0x334] ss:$8 sps:$4 sm:$0xff]   ;;  %v1851_v27 = vld [vmem:[#allocation5 + $0x330] ss:$8 sps:$4 sm:$0xff]   ;;  %v1856_v28 = vld [vmem:[#allocation5 + $0x144] ss:$8 sps:$4 sm:$0xff]  }
  0x6b   :  { %965 = vmatpush1.bf16.msra.mxu1 %v1780_v30  ;;  %v1859_v29 = vld [vmem:[#allocation5 + $0x344] ss:$8 sps:$4 sm:$0xff]   ;;  %v1854_v30 = vld [vmem:[#allocation5 + $0x140] ss:$8 sps:$4 sm:$0xff]   ;;  %v1872_v48 = vld [vmem:[#allocation5 + $0x170] ss:$8 sps:$4 sm:$0xff]  }
  0x6c   :  { %1051 = vmatpush1.bf16.msra.mxu0 %v1781_v31  ;;  %966 = vmatprep.subr.bf16.mxu1 %v1782_v32  ;;  %v1857_v31 = vld [vmem:[#allocation5 + $0x340] ss:$8 sps:$4 sm:$0xff]   ;;  %v1862_v32 = vld [vmem:[#allocation5 + $0x154] ss:$8 sps:$4 sm:$0xff]   ;;  %v1875_v49 = vld [vmem:[#allocation5 + $0x370] ss:$8 sps:$4 sm:$0xff]  }
  0x6d   :  { %1052 = vmatprep.subr.bf16.mxu0 %v1784_v33  ;;  %v1865_v33 = vld [vmem:[#allocation5 + $0x354] ss:$8 sps:$4 sm:$0xff]   ;;  %v1878_v52 = vld [vmem:[#allocation5 + $0x180] ss:$8 sps:$4 sm:$0xff]   ;;  %v1908_v8 = vld [vmem:[#allocation5 + $0x1d0] ss:$8 sps:$4 sm:$0xff]  }
  0x6e   :  { %v1881_v53 = vld [vmem:[#allocation5 + $0x380] ss:$8 sps:$4 sm:$0xff]   ;;  %v1886_v54 = vld [vmem:[#allocation5 + $0x194] ss:$8 sps:$4 sm:$0xff]   ;;  %v1911_v9 = vld [vmem:[#allocation5 + $0x3d0] ss:$8 sps:$4 sm:$0xff]  }
  0x6f   :  { %967 = vmatpush1.bf16.msra.mxu1 %v1786_v34  ;;  %v1860_v34 = vld [vmem:[#allocation5 + $0x150] ss:$8 sps:$4 sm:$0xff]   ;;  %v1889_v55 = vld [vmem:[#allocation5 + $0x394] ss:$8 sps:$4 sm:$0xff]   ;;  %v1916_v10 = vld [vmem:[#allocation5 + $0x1e4] ss:$8 sps:$4 sm:$0xff]  }
  0x70   :  { %1053 = vmatpush1.bf16.msra.mxu0 %v1787_v35  ;;  %968 = vmatprep.subr.bf16.mxu1 %v1788_v36  ;;  %v1863_v35 = vld [vmem:[#allocation5 + $0x350] ss:$8 sps:$4 sm:$0xff]   ;;  %v1868_v36 = vld [vmem:[#allocation5 + $0x164] ss:$8 sps:$4 sm:$0xff]   ;;  %v1910_v6 = vld [vmem:[#allocation5 + $0x1d4] ss:$8 sps:$4 sm:$0xff]  }
  0x71   :  { %1054 = vmatprep.subr.bf16.mxu0 %v1790_v37  ;;  %v1871_v37 = vld [vmem:[#allocation5 + $0x364] ss:$8 sps:$4 sm:$0xff]  }
  0x73   :  { %969 = vmatpush1.bf16.msra.mxu1 %v1792_v38  ;;  %v1866_v38 = vld [vmem:[#allocation5 + $0x160] ss:$8 sps:$4 sm:$0xff]  }
  0x74   :  { %1055 = vmatpush1.bf16.msra.mxu0 %v1793_v39  ;;  %970 = vmatprep.subr.bf16.mxu1 %v1794_v40  ;;  %v1869_v39 = vld [vmem:[#allocation5 + $0x360] ss:$8 sps:$4 sm:$0xff]   ;;  %v1874_v40 = vld [vmem:[#allocation5 + $0x174] ss:$8 sps:$4 sm:$0xff]  }
  0x75   :  { %1056 = vmatprep.subr.bf16.mxu0 %v1796_v41  ;;  %v86_v41 = vld [vmem:[#allocation2 + $0x18] sm:$0xff] }
  0x77   :  { %971 = vmatpush1.bf16.msra.mxu1 %v1798_v42  ;;  %v95_v42 = vld [vmem:[#allocation2 + $0x60] sm:$0xff] }
  0x78   :  { %1057 = vmatpush1.bf16.msra.mxu0 %v1799_v43  ;;  %972 = vmatprep.subr.bf16.mxu1 %v1800_v44  ;;  %v1877_v43 = vld [vmem:[#allocation5 + $0x374] ss:$8 sps:$4 sm:$0xff]   ;;  %v104_v44 = vpack.c.bf16 %v95_v42, %v86_v41  ;;  %v1939_v42 = vld [vmem:[#allocation7] sm:$0xff]  }
  0x79   :  { %1058 = vmatprep.subr.bf16.mxu0 %v1802_v45  ;;  %v90_v45 = vld [vmem:[#allocation2 + $0x38] sm:$0xff] }
  0x7b   :  { %973 = vmatpush1.bf16.msra.mxu1 %v1804_v46  ;;  %v99_v46 = vld [vmem:[#allocation2 + $0x80] sm:$0xff] }
  0x7c   :  { %1059 = vmatpush1.bf16.msra.mxu0 %v1805_v47  ;;  %974 = vmatprep.subr.bf16.mxu1 %v1806_v50  ;;  %v108_v47 = vpack.c.bf16 %v99_v46, %v90_v45  ;;  %v1880_v50 = vld [vmem:[#allocation5 + $0x184] ss:$8 sps:$4 sm:$0xff]   ;;  %v1942_v45 = vld [vmem:[#allocation7 + $0x50] sm:$0xff]  }
  0x7d   :  { %1060 = vmatprep.subr.bf16.mxu0 %v1808_v51  ;;  %v1883_v51 = vld [vmem:[#allocation5 + $0x384] ss:$8 sps:$4 sm:$0xff]   ;;  %v1943_v46 = vld [vmem:[#allocation7 + $0x10] sm:$0xff]  }
  0x7f   :  { %975 = vmatpush1.bf16.msra.mxu1 %v1810_v56  ;;  %v1884_v56 = vld [vmem:[#allocation5 + $0x190] ss:$8 sps:$4 sm:$0xff]  }
  0x80   :  { %1061 = vmatpush1.bf16.msra.mxu0 %v1811_v57  ;;  %976 = vmatprep.subr.bf16.mxu1 %v1812_v58  ;;  %v1887_v57 = vld [vmem:[#allocation5 + $0x390] ss:$8 sps:$4 sm:$0xff]   ;;  %v1892_v58 = vld [vmem:[#allocation5 + $0x1a4] ss:$8 sps:$4 sm:$0xff]  }
  0x81   :  { %1062 = vmatprep.subr.bf16.mxu0 %v1814_v59  ;;  %v1895_v59 = vld [vmem:[#allocation5 + $0x3a4] ss:$8 sps:$4 sm:$0xff]  }
  0x83   :  { %977 = vmatpush1.bf16.msra.mxu1 %v1816_v60  ;;  %v1890_v60 = vld [vmem:[#allocation5 + $0x1a0] ss:$8 sps:$4 sm:$0xff]  }
  0x84   :  { %1063 = vmatpush1.bf16.msra.mxu0 %v1817_v61  ;;  %978 = vmatprep.subr.bf16.mxu1 %v1818_v62  ;;  %v1893_v61 = vld [vmem:[#allocation5 + $0x3a0] ss:$8 sps:$4 sm:$0xff]   ;;  %v1898_v62 = vld [vmem:[#allocation5 + $0x1b4] ss:$8 sps:$4 sm:$0xff]  }
  0x85   :  { %1064 = vmatprep.subr.bf16.mxu0 %v1820_v63  ;;  %v1901_v63 = vld [vmem:[#allocation5 + $0x3b4] ss:$8 sps:$4 sm:$0xff]  }
  0x87   :  { %979 = vmatpush1.bf16.msra.mxu1 %v1822_v0  ;;  %v1896_v0 = vld [vmem:[#allocation5 + $0x1b0] ss:$8 sps:$4 sm:$0xff]  }
  0x88   :  { %1065 = vmatpush1.bf16.msra.mxu0 %v1823_v1  ;;  %980 = vmatprep.subr.bf16.mxu1 %v1824_v2  ;;  %v1899_v1 = vld [vmem:[#allocation5 + $0x3b0] ss:$8 sps:$4 sm:$0xff]   ;;  %v1904_v2 = vld [vmem:[#allocation5 + $0x1c4] ss:$8 sps:$4 sm:$0xff]  }
  0x89   :  { %1066 = vmatprep.subr.bf16.mxu0 %v1826_v3  ;;  %v1907_v3 = vld [vmem:[#allocation5 + $0x3c4] ss:$8 sps:$4 sm:$0xff]  }
  0x8b   :  { %981 = vmatpush1.bf16.msra.mxu1 %v1828_v4  ;;  %v1902_v4 = vld [vmem:[#allocation5 + $0x1c0] ss:$8 sps:$4 sm:$0xff]  }
  0x8c   :  { %1067 = vmatpush1.bf16.msra.mxu0 %v1829_v5  ;;  %993 = vmatprep.subr.bf16.mxu1 %v1832_v7  ;;  %v1905_v5 = vld [vmem:[#allocation5 + $0x3c0] ss:$8 sps:$4 sm:$0xff]   ;;  %v1913_v7 = vld [vmem:[#allocation5 + $0x3d4] ss:$8 sps:$4 sm:$0xff]  }
  0x8d   :  { %1079 = vmatprep.subr.bf16.mxu0 %v1835_v11  ;;  %v1919_v11 = vld [vmem:[#allocation5 + $0x3e4] ss:$8 sps:$4 sm:$0xff]  }
  0x8e   :  { %983 = vmatmul.mubr.bf16.vlgmr.msra.gmra.mrb[0].mxu1 %v101_v14  ;;  %v1922_v14 = vld [vmem:[#allocation5 + $0x1f4] ss:$8 sps:$4 sm:$0xff]  }
  0x8f   :  { %1069 = vmatmul.mubr.bf16.vlgmr.msra.gmra.mrb[0].mxu0 %v105_v15  ;;  %994 = vmatpush1.bf16.msra.mxu1 %v1830_v12  ;;  %v1914_v12 = vld [vmem:[#allocation5 + $0x1e0] ss:$8 sps:$4 sm:$0xff]   ;;  %v1925_v15 = vld [vmem:[#allocation5 + $0x3f4] ss:$8 sps:$4 sm:$0xff]  }
  0x90   :  { %1080 = vmatpush1.bf16.msra.mxu0 %v1833_v13  ;;  %995 = vmatprep.subr.bf16.mxu1 %v1838_v16  ;;  %v1917_v13 = vld [vmem:[#allocation5 + $0x3e0] ss:$8 sps:$4 sm:$0xff]   ;;  %v1920_v16 = vld [vmem:[#allocation5 + $0x1f0] ss:$8 sps:$4 sm:$0xff]  }
  0x91   :  { %1081 = vmatprep.subr.bf16.mxu0 %v1841_v17  ;;  %1025 = vmatprep.mubr.bf16.mxu1 %v104_v44  ;;  %v1923_v17 = vld [vmem:[#allocation5 + $0x3f0] ss:$8 sps:$4 sm:$0xff]   ;;  %v1941_v44 = vld [vmem:[#allocation7 + $0x8] sm:$0xff]  }
  0x92   :  { %1111 = vmatprep.mubr.bf16.mxu0 %v108_v47  ;;  %v1944_v47 = vld [vmem:[#allocation7 + $0x58] sm:$0xff]  }
  0x93   :  { %996 = vmatpush1.bf16.msra.mxu1 %v1836_v18  ;;  %v85_v18 = vld [vmem:[#allocation2 + $0x10] sm:$0xff] }
  0x94   :  { %1082 = vmatpush1.bf16.msra.mxu0 %v1839_v19  ;;  %997 = vmatprep.subr.bf16.mxu1 %v1844_v20  ;;  %v94_v19 = vld [vmem:[#allocation2 + $0x58] sm:$0xff]  ;;  %v89_v20 = vld [vmem:[#allocation2 + $0x30] sm:$0xff] }
  0x95   :  { %1083 = vmatprep.subr.bf16.mxu0 %v1847_v21  ;;  %v98_v21 = vld [vmem:[#allocation2 + $0x78] sm:$0xff] }
  0x97   :  { %998 = vmatpush1.bf16.msra.mxu1 %v1842_v22  ;;  %v1928_v22 = vld [vmem:[#allocation5 + $0x404] ss:$8 sps:$4 sm:$0xff]  }
  0x98   :  { %1084 = vmatpush1.bf16.msra.mxu0 %v1845_v23  ;;  %999 = vmatprep.subr.bf16.mxu1 %v1850_v24  ;;  %v103_v23 = vpack.c.bf16 %v94_v19, %v85_v18  ;;  %v107_v24 = vpack.c.bf16 %v98_v21, %v89_v20 }
  0x99   :  { %1085 = vmatprep.subr.bf16.mxu0 %v1853_v25  ;;  %v1926_v25 = vld [vmem:[#allocation5 + $0x400] ss:$8 sps:$4 sm:$0xff]  }
  0x9b   :  { %1000 = vmatpush1.bf16.msra.mxu1 %v1848_v26  ;;  %v1931_v26 = vld [vmem:[#allocation5 + $0x414] ss:$8 sps:$4 sm:$0xff]  }
  0x9c   :  { %1086 = vmatpush1.bf16.msra.mxu0 %v1851_v27  ;;  %1001 = vmatprep.subr.bf16.mxu1 %v1856_v28  ;;  %v2094_v27 = vmov 65535  }
  0x9d   :  { %1087 = vmatprep.subr.bf16.mxu0 %v1859_v29  ;;  %v942_v28 = vsel %vm940_vm0, 4294967295, %v2094_v27  ;;  %v1929_v29 = vld [vmem:[#allocation5 + $0x410] ss:$8 sps:$4 sm:$0xff]  }
  0x9f   :  { %1002 = vmatpush1.bf16.msra.mxu1 %v1854_v30  ;;  %v2095_v30 = vmov 0  }
  0xa0   :  { %1088 = vmatpush1.bf16.msra.mxu0 %v1857_v31  ;;  %1003 = vmatprep.subr.bf16.mxu1 %v1862_v32  ;;  %v1934_v31 = vld [vmem:[#allocation5 + $0x424] ss:$8 sps:$4 sm:$0xff]   ;;  %v1937_v32 = vld [vmem:[#allocation5 + $0x434] ss:$8 sps:$4 sm:$0x1f]  }
  0xa1   :  { %1089 = vmatprep.subr.bf16.mxu0 %v1865_v33  ;;  %v943_v33 = vsel %vm941_vm1, %v942_v28, 0  ;;  %v1959_v28 = vld [vmem:[#allocation8 + $0x28] sm:$0xff]  }
  0xa3   :  { %1004 = vmatpush1.bf16.msra.mxu1 %v1860_v34  ;;  %v1932_v34 = vld [vmem:[#allocation5 + $0x420] ss:$8 sps:$4 sm:$0xff]  }
  0xa4   :  { %1090 = vmatpush1.bf16.msra.mxu0 %v1863_v35  ;;  %1005 = vmatprep.subr.bf16.mxu1 %v1868_v36  ;;  %v1935_v35 = vld [vmem:[#allocation5 + $0x430] ss:$8 sps:$4 sm:$0x1f]   ;;  %v948_v36 = vand.u32 %v1937_v32, %v943_v33 }
  0xa5   :  { %1091 = vmatprep.subr.bf16.mxu0 %v1871_v37  ;;  %v945_v37 = vand.u32 %v1935_v35, %v943_v33  ;;  %v1622_v32 = vld [vmem:[%s2218_s4] ss:$0 sm:$0xff] }
  0xa7   :  { %1006 = vmatpush1.bf16.msra.mxu1 %v1866_v38  ;;  %v91_v38 = vld [vmem:[#allocation2 + $0x40] sm:$0xff] }
  0xa8   :  { %1092 = vmatpush1.bf16.msra.mxu0 %v1869_v39  ;;  %1007 = vmatprep.subr.bf16.mxu1 %v1874_v40  ;;  %v100_v39 = vld [vmem:[#allocation2 + $0x88] sm:$0xff]  ;;  %v1938_v40 = vld [vmem:[#allocation7 + $0x40] sm:$0xff]  }
  0xa9   :  { %1093 = vmatprep.subr.bf16.mxu0 %v1877_v43  ;;  %v109_v41 = vpack.c.bf16 %v100_v39, %v91_v38  ;;  %v1940_v43 = vld [vmem:[#allocation7 + $0x48] sm:$0xff]  }
  0xab   :  { %1008 = vmatpush1.bf16.msra.mxu1 %v1872_v48  ;;  %v1945_v48 = vld [vmem:[#allocation7 + $0x18] sm:$0xff]  }
  0xac   :  { %1094 = vmatpush1.bf16.msra.mxu0 %v1875_v49  ;;  %1009 = vmatprep.subr.bf16.mxu1 %v1880_v50  ;;  %v1946_v49 = vld [vmem:[#allocation7 + $0x60] sm:$0xff]  }
  0xad   :  { %1095 = vmatprep.subr.bf16.mxu0 %v1883_v51  ;;  %v1947_v50 = vld [vmem:[#allocation7 + $0x20] sm:$0xff]   ;;  %v1948_v51 = vld [vmem:[#allocation7 + $0x68] sm:$0xff]  }
  0xaf   :  { %1010 = vmatpush1.bf16.msra.mxu1 %v1878_v52  ;;  %v1949_v52 = vld [vmem:[#allocation7 + $0x28] sm:$0xff]  }
  0xb0   :  { %1096 = vmatpush1.bf16.msra.mxu0 %v1881_v53  ;;  %1011 = vmatprep.subr.bf16.mxu1 %v1886_v54  ;;  %v1950_v53 = vld [vmem:[#allocation7 + $0x70] sm:$0xff]  }
  0xb1   :  { %1097 = vmatprep.subr.bf16.mxu0 %v1889_v55  ;;  %v1951_v54 = vld [vmem:[#allocation7 + $0x30] sm:$0xff]   ;;  %v1952_v55 = vld [vmem:[#allocation7 + $0x78] sm:$0xff]  }
  0xb3   :  { %1012 = vmatpush1.bf16.msra.mxu1 %v1884_v56  ;;  %v1953_v56 = vld [vmem:[#allocation7 + $0x38] sm:$0xff]  }
  0xb4   :  { %1098 = vmatpush1.bf16.msra.mxu0 %v1887_v57  ;;  %1013 = vmatprep.subr.bf16.mxu1 %v1892_v58  ;;  %v1954_v57 = vld [vmem:[#allocation8] sm:$0xff]   ;;  %v2096_v58 = vmov 0.0  }
  0xb5   :  { %1099 = vmatprep.subr.bf16.mxu0 %v1895_v59  ;;  %v1955_v59 = vld [vmem:[#allocation8 + $0x8] sm:$0xff]  }
  0xb7   :  { %1014 = vmatpush1.bf16.msra.mxu1 %v1890_v60  ;;  %v1956_v60 = vld [vmem:[#allocation8 + $0x10] sm:$0xff]  }
  0xb8   :  { %1100 = vmatpush1.bf16.msra.mxu0 %v1893_v61  ;;  %1015 = vmatprep.subr.bf16.mxu1 %v1898_v62  ;;  %v1957_v61 = vld [vmem:[#allocation8 + $0x18] sm:$0xff]   ;;  %v1958_v62 = vld [vmem:[#allocation8 + $0x20] sm:$0xff]  }
  0xb9   :  { %1101 = vmatprep.subr.bf16.mxu0 %v1901_v63  ;;  %v248_v63 = vlaneseq }
  0xbb   :  { %1016 = vmatpush1.bf16.msra.mxu1 %v1896_v0 }
  0xbc   :  { %1102 = vmatpush1.bf16.msra.mxu0 %v1899_v1  ;;  %1017 = vmatprep.subr.bf16.mxu1 %v1904_v2 }
  0xbd   :  { %1103 = vmatprep.subr.bf16.mxu0 %v1907_v3  ;;  %v249_v3 = vshrl.u32 %v248_v63, 7 }
  0xbf   :  { %1018 = vmatpush1.bf16.msra.mxu1 %v1902_v4 }
  0xc0   :  { %1104 = vmatpush1.bf16.msra.mxu0 %v1905_v5  ;;  %1019 = vmatprep.subr.bf16.mxu1 %v1910_v6  ;;  %v250_v5 = vsub.s32 0, %v249_v3  ;;  %v246_v6 = vld [vmem:[%s2216_s2] sm:$0x3] }
  0xc1   :  { %1105 = vmatprep.subr.bf16.mxu0 %v1913_v7  ;;  %v254_v7 = vsub.s32 1, %v249_v3 }
  0xc3   :  { %1020 = vmatpush1.bf16.msra.mxu1 %v1908_v8  ;;  %v251_v8 = vrot.slane %v246_v6, %v250_v5 }
  0xc4   :  { %1106 = vmatpush1.bf16.msra.mxu0 %v1911_v9  ;;  %1021 = vmatprep.subr.bf16.mxu1 %v1916_v10  ;;  %v255_v9 = vrot.slane %v246_v6, %v254_v7 }
  0xc5   :  { %1107 = vmatprep.subr.bf16.mxu0 %v1919_v11 }
  0xc7   :  { %1022 = vmatpush1.bf16.msra.mxu1 %v1914_v12 }
  0xc8   :  { %1108 = vmatpush1.bf16.msra.mxu0 %v1917_v13  ;;  %1023 = vmatprep.subr.bf16.mxu1 %v1922_v14 }
  0xc9   :  { %1109 = vmatprep.subr.bf16.mxu0 %v1925_v15 }
  0xcb   :  { %1024 = vmatpush1.bf16.msra.mxu1 %v1920_v16 }
  0xcc   :  { %1110 = vmatpush1.bf16.msra.mxu0 %v1923_v17  ;;  %1679 = vmatprep.subr.bf16.mxu1 %v2096_v58 }
  0xcd   :  { %1122 = vmatprep.subr.bf16.mxu0 %v1928_v22 }
  0xce   :  { %1026 = vmatmul.mubr.bf16.vlgmr.msra.gmra.mrb[0].mxu1 %v103_v23 }
  0xcf   :  { %1112 = vmatmul.mubr.bf16.vlgmr.msra.gmra.mrb[0].mxu0 %v107_v24  ;;  %1680 = vmatpush3.bf16.msra.mxu1 %v1954_v57 }
  0xd0   :  { %1123 = vmatpush1.bf16.msra.mxu0 %v1926_v25  ;;  %1154 = vmatprep.mubr.bf16.mxu0 %v2095_v30  ;;  %v1961_v30 = vld [vmem:[#allocation8 + $0x38] sm:$0xff]  }
  0xd1   :  { %1124 = vmatprep.subr.bf16.mxu0 %v1931_v26  ;;  %1681 = vmatprep.subr.bf16.mxu1 %v2096_v58 }
  0xd2   :  { %1695 = vmatprep.mubr.msk.bf16.mxu1 %vm2097_vm3, %v2096_v58 }
  0xd3   :  { %1682 = vmatpush3.bf16.msra.mxu1 %v1955_v59 }
  0xd4   :  { %1125 = vmatpush1.bf16.msra.mxu0 %v1929_v29  ;;  %1683 = vmatprep.subr.bf16.mxu1 %v2096_v58  ;;  %v1960_v29 = vld [vmem:[#allocation8 + $0x30] sm:$0xff]  }
  0xd5   :  { %1126 = vmatprep.subr.bf16.mxu0 %v1934_v31 }
  0xd7   :  { %1684 = vmatpush3.bf16.msra.mxu1 %v1956_v60 }
  0xd8   :  { %1127 = vmatpush1.bf16.msra.mxu0 %v1932_v34  ;;  %1685 = vmatprep.subr.bf16.mxu1 %v2096_v58 }
  0xd9   :  { %1128 = vmatprep.subr.bf16.mxu0 %v948_v36 }
  0xdb   :  { %1686 = vmatpush3.bf16.msra.mxu1 %v1957_v61 }
  0xdc   :  { %1129 = vmatpush1.bf16.msra.mxu0 %v945_v37  ;;  %1687 = vmatprep.subr.bf16.mxu1 %v2096_v58 }
  0xdd   :  { %1648 = vmatprep.subr.bf16.mxu0 %v1938_v40 }
  0xdf   :  { %1621 = vmatmul.mubr.msk.bf16.vlgmr.msra.gmra.mrb[0].mxu0 %vm936_vm2, %v109_v41  ;;  %1688 = vmatpush3.bf16.msra.mxu1 %v1958_v62 }
  0xe0   :  { %1649 = vmatpush3.bf16.msra.mxu0 %v1939_v42  ;;  %1689 = vmatprep.subr.bf16.mxu1 %v2096_v58 }
  0xe1   :  { %1650 = vmatprep.subr.bf16.mxu0 %v1940_v43  ;;  %v1639_v43 = vld [vmem:[%s2220_s6] ss:$0 sm:$0xff] }
  0xe3   :  { %1690 = vmatpush3.bf16.msra.mxu1 %v1959_v28 }
  0xe4   :  { %1651 = vmatpush3.bf16.msra.mxu0 %v1941_v44  ;;  %1691 = vmatprep.subr.bf16.mxu1 %v2096_v58 }
  0xe5   :  { %1652 = vmatprep.subr.bf16.mxu0 %v1942_v45 }
  0xe7   :  { %1692 = vmatpush3.bf16.msra.mxu1 %v1960_v29 }
  0xe8   :  { %1653 = vmatpush3.bf16.msra.mxu0 %v1943_v46  ;;  %1693 = vmatprep.subr.bf16.mxu1 %v2096_v58 }
  0xe9   :  { %1654 = vmatprep.subr.bf16.mxu0 %v1944_v47 }
  0xeb   :  { %1694 = vmatpush3.bf16.msra.mxu1 %v1961_v30 }
  0xec   :  { %1655 = vmatpush3.bf16.msra.mxu0 %v1945_v48 }
  0xed   :  { %1656 = vmatprep.subr.bf16.mxu0 %v1946_v49 }
  0xf0   :  { %1657 = vmatpush3.bf16.msra.mxu0 %v1947_v50 }
  0xf1   :  { %1658 = vmatprep.subr.bf16.mxu0 %v1948_v51 }
  0xf4   :  { %1659 = vmatpush3.bf16.msra.mxu0 %v1949_v52 }
  0xf5   :  { %1660 = vmatprep.subr.bf16.mxu0 %v1950_v53 }
  0xf8   :  { %1661 = vmatpush3.bf16.msra.mxu0 %v1951_v54 }
  0xf9   :  { %1662 = vmatprep.subr.bf16.mxu0 %v1952_v55 }
  0xfc   :  { %1663 = vmatpush3.bf16.msra.mxu0 %v1953_v56 }
 0x1a1   :  { %v1027_v0 = vpop.f32.mrb[0].mxu1 }
 0x1a2   :  { %v1029_v1 = vpop.f32.mrb[1].mxu1  ;;  %v1699_v10 = vadd.f32 %v1027_v0, %v251_v8 }
 0x1a3   :  { %v1031_v2 = vpop.f32.mrb[2].mxu1  ;;  %v1701_v11 = vadd.f32 %v1029_v1, %v255_v9 }
 0x1a4   :  { %v1033_v4 = vpop.f32.mrb[3].mxu1  ;;  %v1703_v13 = vadd.f32 %v1031_v2, %v251_v8 }
 0x1a5   :  { %v1705_v16 = vadd.f32 %v1033_v4, %v255_v9 }
 0x1b2   :  { %v1156_v12 = vpop.f32.mrb[0].mxu0 }
 0x1b3   :  { %v1700_v14 = vadd.f32 %v1699_v10, %v1156_v12  ;;  %v1158_v15 = vpop.f32.mrb[1].mxu0 }
 0x1b4   :  { %v1702_v17 = vadd.f32 %v1701_v11, %v1158_v15  ;;  %v1160_v18 = vpop.f32.mrb[2].mxu0 }
 0x1b5   :  { %v1704_v19 = vadd.f32 %v1703_v13, %v1160_v18  ;;  %v1162_v20 = vpop.f32.mrb[3].mxu0  ;;  %v1165_v22 = vmax.f32 %v1700_v14, 0.0 }
 0x1b6   :  { %v1706_v21 = vadd.f32 %v1705_v16, %v1162_v20  ;;  %v1166_v24 = vmax.f32 %v1702_v17, 0.0 }
 0x1b7   :  { %v1167_v23 = vmax.f32 %v1704_v19, 0.0 }
 0x1b8   :  { %v1168_v25 = vmax.f32 %v1706_v21, 0.0 }
 0x1b9   :  { %v1169_v26 = vpack.c.bf16 %v1167_v23, %v1165_v22 }
 0x1ba   :  { %v1170_v27 = vpack.c.bf16 %v1168_v25, %v1166_v24 }
 0x1bc   :  { %1338 = vmatprep.mubr.bf16.mxu0 %v1170_v27 }
 0x1bd   :  { %1339 = vmatmul.mubr.bf16.vlgmr.msra.gmra.mrb[4].mxu0 %v1169_v26 }
 0x290   :  { %v1664_v31 = vpop.f32.mrb[4].mxu0 }
 0x291   :  { %v1665_v33 = vpop.f32.mrb[5].mxu0 }
 0x292   :  { %v1666_v34 = vadd.f32 %v1665_v33, %v1664_v31  ;;  %v1667_v35 = vpop.f32.mrb[6].mxu0 }
 0x293   :  { %v1668_v36 = vpop.f32.mrb[7].mxu0 }
 0x294   :  { %v1341_v37 = vadd.f32 %v1666_v34, %v1622_v32  ;;  %v1669_v38 = vadd.f32 %v1668_v36, %v1667_v35 }
 0x296   :  { %v1344_v39 = vadd.f32 %v1669_v38, %v1622_v32  ;;  %v1347_v40 = vmax.f32 %v1341_v37, 0.0 }
 0x298   :  { %v1348_v41 = vmax.f32 %v1344_v39, 0.0 }
 0x29a   :  { %v1349_v42 = vpack.c.bf16 %v1348_v41, %v1347_v40 }
 0x29c   :  { %1696 = vmatmul.mubr.bf16.vlgmr.msra.gmra.mrb[4].mxu1 %v1349_v42 }
 0x36f   :  { %v1455_v44 = vpop.f32.mrb[4].mxu1 }
 0x370   :  { %v1456_v45 = vadd.f32 %v1639_v43, %v1455_v44  ;;  %v1697_v46 = vpop.f32.mrb[5].mxu1 }
 0x371   :  { %v1458_v47 = vpop.f32.mrb[6].mxu1 }
 0x372   :  { %1962 = vtanh.f32 %v1456_v45  ;;  %v1459_v48 = vadd.f32 %v1639_v43, %v1458_v47  ;;  %v1698_v49 = vpop.f32.mrb[7].mxu1 }
 0x374   :  { %1964 = vtanh.f32 %v1459_v48 }
 0x37c   :  { %v1963_v50 = vpop.eup %1962 }
 0x37d   :  { %1464 = vst [vmem:[#allocation10] sm:$0xff] %v1963_v50 }
 0x37e   :  { %v1965_v51 = vpop.eup %1964 }
 0x37f   :  { %1465 = vst [vmem:[#allocation10 + $0x8] sm:$0xff] %v1965_v51 }
 0x380   :  { %1470 = vsyncadd [#allocation4], 128  ;;  %s2098_s4 = smov [#allocation10]  }
 0x381   :  { %s1471_s14 = sshll.u32 %s2098_s4, 4  ;;  %s1472_s14 = int_to_ptr.vmem [resolvable:$true] %s1471_s14 }
 0x382   :  { %s2054_s15 = scalar_lea.vmem %s1472_s14, 128  ;;  %s2058_s17 = scalar_lea.vmem %s1472_s14, 256 }
 0x383   :  { %p2055_p4 = scmp.ne.s32.totalorder %s1472_s14, %s2054_s15  ;;  %p2059_p5 = scmp.lt.s32.totalorder %s1472_s14, %s1472_s14 }
 0x384   :  { %p2060_p6 = scmp.lt.s32.totalorder %s2058_s17, %s2054_s15 }
 0x386   :  { %p2061_p7 = por %p2060_p6, %p2059_p5 }
 0x388   :  { %p2062_p8 = pnand %p2061_p7, %p2055_p4 }
 0x38a   :  { %2065 = shalt.err (!%p2062_p8)
}
 0x38b   :  { %s2066_s0 = scalar_lea.hbm %s2221_s7, 128 }
 0x38c   :  { %p2067_p9 = scmp.ne.s32.totalorder %s2221_s7, %s2066_s0  ;;  %p2070_p10 = scmp.lt.u32.totalorder %s2066_s0, %s2221_s7 }
 0x38e   :  { %p2072_p11 = pnand %p2070_p10, %p2067_p9 }
 0x390   :  { %2075 = shalt.err (!%p2072_p11)
}
 0x391   :  { %1477 = dma.vmem_to_hbm [thread:$0]  %s1472_s14, 128, %s2221_s7, [#allocation4], %s2085_s11, %s2085_s11, %s2086_s12  }
 0x392   :  { %2082 = dma.done.wait [#allocation4], 256  }
 0x393   :  { %2083 = vsyncadd [#allocation4], 4294967040 }
 0x394   :  { %1481 = vsyncpa [#allocation3], 1 }
 0x395   :  { %1482 = vsyncpa [#allocation6], 1 }
 0x396   :  { %1483 = vsyncpa [#allocation9], 1 }
 0x397   :  { %1484 = vsyncpa [#allocation4], 1 }

</bundles_post_ra>
